<compile_context>
chip_gen: v7x
topology: tpu7x:2x2x1
jax: 0.10.0
libtpu: 0.0.40
codegen_flags: <defaults>
</compile_context>

<pallas_src>
import functools

import jax
import jax.numpy as jnp
from jax.experimental import pallas as pl
from jax.experimental.pallas import tpu as pltpu


# ----------------------------------------------------------------------------
# Fused forward kernel.  One grid step processes `tb` batch elements, folded into
# the sublane (row) axis: element e occupies rows [e*P, e*P+L) of every activation.
#
# Ref order: mask, sel, x, [per block: w1, b1, w2, b2, (wd, bd)], fc_w, fc_b, out, act
#   mask : (R, 1)  f32   1.0 on the L real time rows of each element, 0.0 on halo rows
#   sel  : (tb, R) bf16  one-hot rows selecting each element's last real time step
#   x    : (R + pad_max, cin0) bf16, zero halo/tail rows baked in host-side
#   w1   : (k*cin, cout) bf16 (taps stacked into K)     b1 : (1, cout) f32
#   w2   : (k*cout, cout) bf16                          b2 : (1, cout) f32
#   wd   : (cin, cout) bf16   bd : (1, cout) f32        (only when cin != cout)
#   fc_w : (c_last, 1) bf16   fc_b : (1, 1) f32
#   out  : (tb, 1) f32
#   act  : VMEM (R + pad_max, c_slab) bf16 scratch (never memset; see header notes)
# ----------------------------------------------------------------------------
def _tcn_forward_kernel(*refs, R, k, cin0, channels, dilations, has_ds):
    it = iter(refs)
    mask_ref = next(it)
    sel_ref = next(it)
    x_ref = next(it)
    layer_refs = []
    for ds in has_ds:
        w1 = next(it); b1 = next(it); w2 = next(it); b2 = next(it)
        wd = next(it) if ds else None
        bd = next(it) if ds else None
        layer_refs.append((w1, b1, w2, b2, wd, bd))
    fc_w_ref = next(it)
    fc_b_ref = next(it)
    out_ref = next(it)
    act_ref = next(it)

    valid = mask_ref[...] > 0.0                         # (R, 1) bool, reused every layer

    def dconv(src, w_ref, b_ref, c_in, d):
        """Dilated conv: k shifted tap REF reads, lane-concatenated, ONE MXU matmul."""
        if k == 1:
            taps = src[pl.ds(0, R), pl.ds(0, c_in)]
        else:
            taps = jnp.concatenate(
                [src[pl.ds(j * d, R), pl.ds(0, c_in)] for j in range(k)], axis=-1)
        return jnp.dot(taps, w_ref[...], preferred_element_type=jnp.float32) + b_ref[...]

    src = x_ref
    cin = cin0
    n_layers = len(layer_refs)
    y = None
    for i, (w1, b1, w2, b2, wd, bd) in enumerate(layer_refs):
        d = dilations[i]
        cout = channels[i]

        # Residual must be read BEFORE h overwrites slab columns [0, cout).
        res_in = src[pl.ds(0, R), pl.ds(0, cin)]        # (R, cin) bf16

        # conv1 -> ReLU (dropout1 = identity in eval); halo rows forced to EXACT zero via
        # select (NaN/garbage safe, so the scratch slab never needs a memset).
        h = jnp.where(valid, jnp.maximum(dconv(src, w1, b1, cin, d), 0.0), 0.0)
        act_ref[pl.ds(0, R), pl.ds(0, cout)] = h.astype(jnp.bfloat16)

        # conv2 (dropout2 = identity); spec trims 2*pad from the FRONT -> back-shifted taps.
        o = dconv(act_ref, w2, b2, cout, d)

        # residual: 1x1 downsample conv, or exact identity (statically skipped matmul)
        if wd is not None:
            res = jnp.dot(res_in, wd[...], preferred_element_type=jnp.float32) + bd[...]
        else:
            res = res_in.astype(jnp.float32)

        y = jnp.where(valid, jnp.maximum(o + res, 0.0), 0.0)   # relu2 + halo re-zero
        if i + 1 < n_layers:                             # final layer's y feeds only the head
            act_ref[pl.ds(0, R), pl.ds(0, cout)] = y.astype(jnp.bfloat16)
            src = act_ref
        cin = cout

    # ---- fused head: pick each element's last real time step with a one-hot selector
    #      matmul (tiny MXU work), then Linear(C_last, 1); single contiguous store. ----
    y_last = jnp.dot(sel_ref[...], y.astype(jnp.bfloat16),
                     preferred_element_type=jnp.float32)          # (tb, c_last)
    out_ref[...] = jnp.dot(y_last.astype(jnp.bfloat16), fc_w_ref[...],
                           preferred_element_type=jnp.float32) + fc_b_ref[...]


# ----------------------------------------------------------------------------
# Wrapper: host-side layout + the fused pallas_call.
# ----------------------------------------------------------------------------
def tcn_forecast(x, params, *, kernel_size):
    """x: (B, seq_len, input_size) f32 -> (B,) f32   (matches TCNForecast.forward)."""
    B, L, cin0 = x.shape
    blocks = params["blocks"]
    n_layers = len(blocks)
    assert n_layers >= 1
    k = kernel_size
    channels = [int(blk["b1"].shape[-1]) for blk in blocks]
    dilations = [2 ** i for i in range(n_layers)]
    pad_max = (k - 1) * dilations[-1]
    c_slab = max(channels)
    c_last = channels[-1]

    # --- batch tiling: >= 2 grid steps whenever B >= 2 (both v7x TCs get work),
    #     up to 8 elements folded into the sublane axis per step, VMEM-guarded. ---
    P = -(-(L + pad_max) // 8) * 8          # per-element row period, sublane aligned
    cap = 8
    while cap > 1 and (cap * P + pad_max) * c_slab * 2 > (8 << 20):   # bf16 slab guard
        cap //= 2
    tb = max(1, min(cap, B // 2)) if B >= 2 else 1
    G = -(-B // tb)
    Bp = G * tb
    R = tb * P
    Rx = R + pad_max

    # --- host-side layout of x: (G, Rx, cin0) bf16, each element in a P-row slot with
    #     genuine zero halo rows and a zero tail (no in-kernel memset / scatter). ---
    xb = x.astype(jnp.bfloat16)
    if Bp != B:
        xb = jnp.pad(xb, ((0, Bp - B), (0, 0), (0, 0)))
    xb = xb.reshape(G, tb, L, cin0)
    xb = jnp.pad(xb, ((0, 0), (0, 0), (0, P - L), (0, 0)))     # per-element halo rows
    xb = xb.reshape(G, tb * P, cin0)
    xb = jnp.pad(xb, ((0, 0), (0, pad_max), (0, 0)))           # zero tail rows -> (G, Rx, cin0)

    # grid-invariant helpers: row-validity mask + one-hot last-step selector
    mask = jnp.tile((jnp.arange(P) < L).astype(jnp.float32), (tb,))[:, None]        # (R, 1)
    sel = jnp.zeros((tb, R), jnp.float32)
    sel = sel.at[jnp.arange(tb), jnp.arange(tb) * P + (L - 1)].set(1.0).astype(jnp.bfloat16)

    inputs = [mask, sel, xb]
    in_specs = [pl.BlockSpec((R, 1), lambda b: (0, 0)),
                pl.BlockSpec((tb, R), lambda b: (0, 0)),
                pl.BlockSpec((None, Rx, cin0), lambda b: (b, 0, 0))]

    has_ds = []
    cin = cin0
    for blk, cout in zip(blocks, channels):
        # Taps folded into the contraction dim host-side: (k, cin, cout) -> (k*cin, cout).
        inputs += [blk["w1"].astype(jnp.bfloat16).reshape(k * cin, cout), blk["b1"],
                   blk["w2"].astype(jnp.bfloat16).reshape(k * cout, cout), blk["b2"]]
        in_specs += [pl.BlockSpec((k * cin, cout), lambda b: (0, 0)),
                     pl.BlockSpec((1, cout), lambda b: (0, 0)),
                     pl.BlockSpec((k * cout, cout), lambda b: (0, 0)),
                     pl.BlockSpec((1, cout), lambda b: (0, 0))]
        ds = blk["wd"] is not None
        has_ds.append(ds)
        if ds:
            inputs += [blk["wd"].astype(jnp.bfloat16), blk["bd"]]
            in_specs += [pl.BlockSpec((cin, cout), lambda b: (0, 0)),
                         pl.BlockSpec((1, cout), lambda b: (0, 0))]
        cin = cout
    inputs += [params["fc_w"].astype(jnp.bfloat16), params["fc_b"]]
    in_specs += [pl.BlockSpec((c_last, 1), lambda b: (0, 0)),
                 pl.BlockSpec((1, 1), lambda b: (0, 0))]

    kernel = functools.partial(
        _tcn_forward_kernel, R=R, k=k, cin0=cin0,
        channels=tuple(channels), dilations=tuple(dilations), has_ds=tuple(has_ds))

    # Explicit VMEM budget: v5e's scoped default is only 16 MiB; cap at v7x's 64 MiB.
    def _nbytes(a):
        return a.size * a.dtype.itemsize
    est = (Rx * c_slab * 2                              # bf16 activation slab
           + 2 * sum(_nbytes(a) for a in inputs)        # inputs (double-buffered, generous)
           + 2 * Bp * 4)                                # output
    vmem_limit = int(min(64 << 20, max(16 << 20, 4 * est)))

    out = pl.pallas_call(
        kernel,
        out_shape=jax.ShapeDtypeStruct((G, tb, 1), jnp.float32),
        grid_spec=pltpu.PrefetchScalarGridSpec(
            num_scalar_prefetch=0,
            grid=(G,),
            in_specs=in_specs,
            out_specs=pl.BlockSpec((None, tb, 1), lambda b: (b, 0, 0)),
            scratch_shapes=[pltpu.VMEM((Rx, c_slab), jnp.bfloat16)],
        ),
        compiler_params=pltpu.CompilerParams(
            dimension_semantics=("parallel",),
            vmem_limit_bytes=vmem_limit),
    )(*inputs)
    return out.reshape(Bp)[:B]


# ----------------------------------------------------------------------------
# Pure-JAX reference (mirrors the PyTorch forward in eval mode, channels-last,
# with the same bf16 matmul inputs / f32 accumulation as the kernel).
# ----------------------------------------------------------------------------
def _ref_temporal_block(x, blk, k, d):
    B, L, cin = x.shape
    pad = (k - 1) * d
    w1 = blk["w1"].astype(jnp.bfloat16)
    w2 = blk["w2"].astype(jnp.bfloat16)

    xp = jnp.pad(x, ((0, 0), (pad, pad), (0, 0)))
    L1 = L + pad                                 # conv1 output length
    c1 = sum(jnp.einsum("btc,cd->btd", xp[:, j * d:j * d + L1, :].astype(jnp.bfloat16),
                        w1[j], preferred_element_type=jnp.float32)
             for j in range(k)) + blk["b1"]
    h = jnp.maximum(c1, 0.0)

    hp = jnp.pad(h, ((0, 0), (pad, pad), (0, 0)))
    L2 = L1 + pad                                # conv2 output length
    c2 = sum(jnp.einsum("btc,cd->btd", hp[:, j * d:j * d + L2, :].astype(jnp.bfloat16),
                        w2[j], preferred_element_type=jnp.float32)
             for j in range(k)) + blk["b2"]
    out_trim = c2[:, 2 * pad:, :]                # spec trims 2*pad from the FRONT

    if blk["wd"] is not None:
        res = jnp.einsum("btc,cd->btd", x.astype(jnp.bfloat16),
                         blk["wd"].astype(jnp.bfloat16),
                         preferred_element_type=jnp.float32) + blk["bd"]
    else:
        res = x
    return jnp.maximum(out_trim + res, 0.0)


def tcn_forecast_ref(x, params, *, kernel_size):
    y = x
    for i, blk in enumerate(params["blocks"]):
        y = _ref_temporal_block(y, blk, kernel_size, 2 ** i)
    y_last = y[:, -1, :]
    out = jnp.dot(y_last.astype(jnp.bfloat16), params["fc_w"].astype(jnp.bfloat16),
                  preferred_element_type=jnp.float32) + params["fc_b"]
    return out[:, 0]


# ----------------------------------------------------------------------------
# Deterministic parameter init (kaiming-normal conv weights like init_weights,
# PyTorch-style uniform biases).  Conv weights stored as (k, Cin, Cout), i.e. the
# transpose of PyTorch's (Cout, Cin, k).  No downsample -> wd/bd are None.
# ----------------------------------------------------------------------------
def init_params(key, input_size, num_channels, kernel_size):
    blocks = []
    cin = input_size
    for cout in num_channels:
        key, k1, k2, k3, k4, k5, k6 = jax.random.split(key, 7)
        fan1 = cin * kernel_size
        fan2 = cout * kernel_size
        w1 = jax.random.normal(k1, (kernel_size, cin, cout), jnp.float32) * (2.0 / fan1) ** 0.5
        b1 = jax.random.uniform(k2, (1, cout), jnp.float32,
                                -(1.0 / fan1) ** 0.5, (1.0 / fan1) ** 0.5)
        w2 = jax.random.normal(k3, (kernel_size, cout, cout), jnp.float32) * (2.0 / fan2) ** 0.5
        b2 = jax.random.uniform(k4, (1, cout), jnp.float32,
                                -(1.0 / fan2) ** 0.5, (1.0 / fan2) ** 0.5)
        if cin != cout:
            wd = jax.random.normal(k5, (cin, cout), jnp.float32) * (2.0 / cin) ** 0.5
            bd = jax.random.uniform(k6, (1, cout), jnp.float32,
                                    -(1.0 / cin) ** 0.5, (1.0 / cin) ** 0.5)
        else:
            wd = None      # identity residual: statically skipped in the kernel
            bd = None
        blocks.append(dict(w1=w1, b1=b1, w2=w2, b2=b2, wd=wd, bd=bd))
        cin = cout
    key, kf1, kf2 = jax.random.split(key, 3)
    c_last = num_channels[-1]
    bound = (1.0 / c_last) ** 0.5
    fc_w = jax.random.uniform(kf1, (c_last, 1), jnp.float32, -bound, bound)
    fc_b = jax.random.uniform(kf2, (1, 1), jnp.float32, -bound, bound)
    return dict(blocks=blocks, fc_w=fc_w, fc_b=fc_b)


if __name__ == "__main__":
    # Shapes consistent with TCNForecast(input_size, num_channels, kernel_size, dropout, seq_len)
    input_size = 4
    num_channels = [32, 32]     # block 0: 1x1 downsample residual; block 1: identity residual
    kernel_size = 2
    seq_len = 8
    batch = 2                   # -> tb=1, grid of 2 "parallel" steps

    key = jax.random.PRNGKey(0)
    kx, kp = jax.random.split(key)
    x = jax.random.normal(kx, (batch, seq_len, input_size), jnp.float32)
    params = init_params(kp, input_size, num_channels, kernel_size)

    fwd = jax.jit(functools.partial(tcn_forecast, kernel_size=kernel_size))
    y = fwd(x, params)
    jax.block_until_ready(y)
    assert y.shape == (batch,) and y.dtype == jnp.float32

    y_ref = tcn_forecast_ref(x, params, kernel_size=kernel_size)
    if not jnp.allclose(y, y_ref, rtol=3e-2, atol=3e-2):
        raise AssertionError(f"kernel/reference mismatch: {y} vs {y_ref}")
    print("KERNEL_OK")
</pallas_src>

<mosaic_0001>
module attributes {stable_mosaic.version = 11 : i64} {
  func.func @_tcn_forward_kernel(%arg0: i32, %arg1: memref<16x1xf32, #tpu.memory_space<vmem>>, %arg2: memref<1x16xbf16, #tpu.memory_space<vmem>>, %arg3: memref<1x18x4xbf16, #tpu.memory_space<vmem>>, %arg4: memref<8x32xbf16, #tpu.memory_space<vmem>>, %arg5: memref<1x32xf32, #tpu.memory_space<vmem>>, %arg6: memref<64x32xbf16, #tpu.memory_space<vmem>>, %arg7: memref<1x32xf32, #tpu.memory_space<vmem>>, %arg8: memref<4x32xbf16, #tpu.memory_space<vmem>>, %arg9: memref<1x32xf32, #tpu.memory_space<vmem>>, %arg10: memref<64x32xbf16, #tpu.memory_space<vmem>>, %arg11: memref<1x32xf32, #tpu.memory_space<vmem>>, %arg12: memref<64x32xbf16, #tpu.memory_space<vmem>>, %arg13: memref<1x32xf32, #tpu.memory_space<vmem>>, %arg14: memref<32x1xbf16, #tpu.memory_space<vmem>>, %arg15: memref<1x1xf32, #tpu.memory_space<vmem>>, %arg16: memref<1x1x1xf32, #tpu.memory_space<vmem>>, %arg17: memref<18x32xbf16, #tpu.memory_space<vmem>>) attributes {dimension_semantics = [#tpu.dimension_semantics<parallel>], iteration_bounds = array<i64: 2>, scalar_prefetch = 0 : i64, scratch_operands = 1 : i64, tpu.core_type = #tpu.core_type<tc>, window_params = [{pipeline_mode = #tpu.pipeline_mode<synchronous>, transform_indices = @transform_0, window_bounds = array<i64: 16, 1>}, {pipeline_mode = #tpu.pipeline_mode<synchronous>, transform_indices = @transform_1, window_bounds = array<i64: 1, 16>}, {transform_indices = @transform_2, window_bounds = array<i64: 1, 18, 4>}, {pipeline_mode = #tpu.pipeline_mode<synchronous>, transform_indices = @transform_3, window_bounds = array<i64: 8, 32>}, {pipeline_mode = #tpu.pipeline_mode<synchronous>, transform_indices = @transform_4, window_bounds = array<i64: 1, 32>}, {pipeline_mode = #tpu.pipeline_mode<synchronous>, transform_indices = @transform_5, window_bounds = array<i64: 64, 32>}, {pipeline_mode = #tpu.pipeline_mode<synchronous>, transform_indices = @transform_6, window_bounds = array<i64: 1, 32>}, {pipeline_mode = #tpu.pipeline_mode<synchronous>, transform_indices = @transform_7, window_bounds = array<i64: 4, 32>}, {pipeline_mode = #tpu.pipeline_mode<synchronous>, transform_indices = @transform_8, window_bounds = array<i64: 1, 32>}, {pipeline_mode = #tpu.pipeline_mode<synchronous>, transform_indices = @transform_9, window_bounds = array<i64: 64, 32>}, {pipeline_mode = #tpu.pipeline_mode<synchronous>, transform_indices = @transform_10, window_bounds = array<i64: 1, 32>}, {pipeline_mode = #tpu.pipeline_mode<synchronous>, transform_indices = @transform_11, window_bounds = array<i64: 64, 32>}, {pipeline_mode = #tpu.pipeline_mode<synchronous>, transform_indices = @transform_12, window_bounds = array<i64: 1, 32>}, {pipeline_mode = #tpu.pipeline_mode<synchronous>, transform_indices = @transform_13, window_bounds = array<i64: 32, 1>}, {pipeline_mode = #tpu.pipeline_mode<synchronous>, transform_indices = @transform_14, window_bounds = array<i64: 1, 1>}, {transform_indices = @transform_15, window_bounds = array<i64: 1, 1, 1>}]} {
    %c0 = arith.constant 0 : index
    %c0_0 = arith.constant 0 : index
    %0 = vector.load %arg1[%c0, %c0_0] : memref<16x1xf32, #tpu.memory_space<vmem>>, vector<16x1xf32>
    %cst = arith.constant 0.000000e+00 : f32
    %1 = vector.broadcast %cst : f32 to vector<16x1xf32>
    %2 = arith.cmpf ogt, %0, %1 : vector<16x1xf32>
    %c0_1 = arith.constant 0 : index
    %c0_2 = arith.constant 0 : index
    %c0_3 = arith.constant 0 : index
    %3 = vector.load %arg3[%c0_1, %c0_2, %c0_3] : memref<1x18x4xbf16, #tpu.memory_space<vmem>>, vector<1x16x4xbf16>
    %4 = vector.shape_cast %3 : vector<1x16x4xbf16> to vector<16x4xbf16>
    %c0_4 = arith.constant 0 : index
    %c0_5 = arith.constant 0 : index
    %c0_6 = arith.constant 0 : index
    %5 = vector.load %arg3[%c0_4, %c0_5, %c0_6] : memref<1x18x4xbf16, #tpu.memory_space<vmem>>, vector<1x16x4xbf16>
    %6 = vector.shape_cast %5 : vector<1x16x4xbf16> to vector<16x4xbf16>
    %c0_7 = arith.constant 0 : index
    %c1 = arith.constant 1 : index
    %c0_8 = arith.constant 0 : index
    %7 = vector.load %arg3[%c0_7, %c1, %c0_8] : memref<1x18x4xbf16, #tpu.memory_space<vmem>>, vector<1x16x4xbf16>
    %8 = vector.shape_cast %7 : vector<1x16x4xbf16> to vector<16x4xbf16>
    %9 = tpu.concatenate %6, %8 in 1 : vector<16x4xbf16>, vector<16x4xbf16> -> vector<16x8xbf16>
    %c0_9 = arith.constant 0 : index
    %c0_10 = arith.constant 0 : index
    %10 = vector.load %arg4[%c0_9, %c0_10] : memref<8x32xbf16, #tpu.memory_space<vmem>>, vector<8x32xbf16>
    %cst_11 = arith.constant dense<0.000000e+00> : vector<16x32xf32>
    %11 = tpu.matmul %9, %10, %cst_11 {dimension_numbers = #tpu.dot_dimension_numbers<[1], [0], [0], [1], [0, 0, 1, 1], [], []>} : vector<16x8xbf16>, vector<8x32xbf16>, vector<16x32xf32> -> vector<16x32xf32>
    %c0_12 = arith.constant 0 : index
    %c0_13 = arith.constant 0 : index
    %12 = vector.load %arg5[%c0_12, %c0_13] : memref<1x32xf32, #tpu.memory_space<vmem>>, vector<1x32xf32>
    %13 = vector.broadcast %12 : vector<1x32xf32> to vector<16x32xf32>
    %14 = arith.addf %11, %13 : vector<16x32xf32>
    %cst_14 = arith.constant 0.000000e+00 : f32
    %15 = vector.broadcast %cst_14 : f32 to vector<16x32xf32>
    %16 = arith.maximumf %14, %15 : vector<16x32xf32>
    %cst_15 = arith.constant 0.000000e+00 : f32
    %17 = vector.shape_cast %2 : vector<16x1xi1> to vector<16x1xi1>
    %18 = vector.broadcast %17 : vector<16x1xi1> to vector<16x32xi1>
    %19 = vector.broadcast %cst_15 : f32 to vector<16x32xf32>
    %20 = arith.select %18, %16, %19 : vector<16x32xi1>, vector<16x32xf32>
    %21 = arith.truncf %20 : vector<16x32xf32> to vector<16x32xbf16>
    %c0_16 = arith.constant 0 : index
    %c0_17 = arith.constant 0 : index
    %22 = vector.load %arg17[%c0_16, %c0_17] : memref<18x32xbf16, #tpu.memory_space<vmem>>, vector<16x32xbf16>
    tpu.vector_store %arg17[%c0_16, %c0_17], %21 {strides = array<i32>} : memref<18x32xbf16, #tpu.memory_space<vmem>>, vector<16x32xbf16>,
    %c0_18 = arith.constant 0 : index
    %c0_19 = arith.constant 0 : index
    %23 = vector.load %arg17[%c0_18, %c0_19] : memref<18x32xbf16, #tpu.memory_space<vmem>>, vector<16x32xbf16>
    %c1_20 = arith.constant 1 : index
    %c0_21 = arith.constant 0 : index
    %24 = vector.load %arg17[%c1_20, %c0_21] : memref<18x32xbf16, #tpu.memory_space<vmem>>, vector<16x32xbf16>
    %25 = tpu.concatenate %23, %24 in 1 : vector<16x32xbf16>, vector<16x32xbf16> -> vector<16x64xbf16>
    %c0_22 = arith.constant 0 : index
    %c0_23 = arith.constant 0 : index
    %26 = vector.load %arg6[%c0_22, %c0_23] : memref<64x32xbf16, #tpu.memory_space<vmem>>, vector<64x32xbf16>
    %cst_24 = arith.constant dense<0.000000e+00> : vector<16x32xf32>
    %27 = tpu.matmul %25, %26, %cst_24 {dimension_numbers = #tpu.dot_dimension_numbers<[1], [0], [0], [1], [0, 0, 1, 1], [], []>} : vector<16x64xbf16>, vector<64x32xbf16>, vector<16x32xf32> -> vector<16x32xf32>
    %c0_25 = arith.constant 0 : index
    %c0_26 = arith.constant 0 : index
    %28 = vector.load %arg7[%c0_25, %c0_26] : memref<1x32xf32, #tpu.memory_space<vmem>>, vector<1x32xf32>
    %29 = vector.broadcast %28 : vector<1x32xf32> to vector<16x32xf32>
    %30 = arith.addf %27, %29 : vector<16x32xf32>
    %c0_27 = arith.constant 0 : index
    %c0_28 = arith.constant 0 : index
    %31 = vector.load %arg8[%c0_27, %c0_28] : memref<4x32xbf16, #tpu.memory_space<vmem>>, vector<4x32xbf16>
    %cst_29 = arith.constant dense<0.000000e+00> : vector<16x32xf32>
    %32 = tpu.matmul %4, %31, %cst_29 {dimension_numbers = #tpu.dot_dimension_numbers<[1], [0], [0], [1], [0, 0, 1, 1], [], []>} : vector<16x4xbf16>, vector<4x32xbf16>, vector<16x32xf32> -> vector<16x32xf32>
    %c0_30 = arith.constant 0 : index
    %c0_31 = arith.constant 0 : index
    %33 = vector.load %arg9[%c0_30, %c0_31] : memref<1x32xf32, #tpu.memory_space<vmem>>, vector<1x32xf32>
    %34 = vector.broadcast %33 : vector<1x32xf32> to vector<16x32xf32>
    %35 = arith.addf %32, %34 : vector<16x32xf32>
    %36 = arith.addf %30, %35 : vector<16x32xf32>
    %cst_32 = arith.constant 0.000000e+00 : f32
    %37 = vector.broadcast %cst_32 : f32 to vector<16x32xf32>
    %38 = arith.maximumf %36, %37 : vector<16x32xf32>
    %cst_33 = arith.constant 0.000000e+00 : f32
    %39 = vector.shape_cast %2 : vector<16x1xi1> to vector<16x1xi1>
    %40 = vector.broadcast %39 : vector<16x1xi1> to vector<16x32xi1>
    %41 = vector.broadcast %cst_33 : f32 to vector<16x32xf32>
    %42 = arith.select %40, %38, %41 : vector<16x32xi1>, vector<16x32xf32>
    %43 = arith.truncf %42 : vector<16x32xf32> to vector<16x32xbf16>
    %c0_34 = arith.constant 0 : index
    %c0_35 = arith.constant 0 : index
    %44 = vector.load %arg17[%c0_34, %c0_35] : memref<18x32xbf16, #tpu.memory_space<vmem>>, vector<16x32xbf16>
    tpu.vector_store %arg17[%c0_34, %c0_35], %43 {strides = array<i32>} : memref<18x32xbf16, #tpu.memory_space<vmem>>, vector<16x32xbf16>,
    %c0_36 = arith.constant 0 : index
    %c0_37 = arith.constant 0 : index
    %45 = vector.load %arg17[%c0_36, %c0_37] : memref<18x32xbf16, #tpu.memory_space<vmem>>, vector<16x32xbf16>
    %c0_38 = arith.constant 0 : index
    %c0_39 = arith.constant 0 : index
    %46 = vector.load %arg17[%c0_38, %c0_39] : memref<18x32xbf16, #tpu.memory_space<vmem>>, vector<16x32xbf16>
    %c2 = arith.constant 2 : index
    %c0_40 = arith.constant 0 : index
    %47 = vector.load %arg17[%c2, %c0_40] : memref<18x32xbf16, #tpu.memory_space<vmem>>, vector<16x32xbf16>
    %48 = tpu.concatenate %46, %47 in 1 : vector<16x32xbf16>, vector<16x32xbf16> -> vector<16x64xbf16>
    %c0_41 = arith.constant 0 : index
    %c0_42 = arith.constant 0 : index
    %49 = vector.load %arg10[%c0_41, %c0_42] : memref<64x32xbf16, #tpu.memory_space<vmem>>, vector<64x32xbf16>
    %cst_43 = arith.constant dense<0.000000e+00> : vector<16x32xf32>
    %50 = tpu.matmul %48, %49, %cst_43 {dimension_numbers = #tpu.dot_dimension_numbers<[1], [0], [0], [1], [0, 0, 1, 1], [], []>} : vector<16x64xbf16>, vector<64x32xbf16>, vector<16x32xf32> -> vector<16x32xf32>
    %c0_44 = arith.constant 0 : index
    %c0_45 = arith.constant 0 : index
    %51 = vector.load %arg11[%c0_44, %c0_45] : memref<1x32xf32, #tpu.memory_space<vmem>>, vector<1x32xf32>
    %52 = vector.broadcast %51 : vector<1x32xf32> to vector<16x32xf32>
    %53 = arith.addf %50, %52 : vector<16x32xf32>
    %cst_46 = arith.constant 0.000000e+00 : f32
    %54 = vector.broadcast %cst_46 : f32 to vector<16x32xf32>
    %55 = arith.maximumf %53, %54 : vector<16x32xf32>
    %cst_47 = arith.constant 0.000000e+00 : f32
    %56 = vector.shape_cast %2 : vector<16x1xi1> to vector<16x1xi1>
    %57 = vector.broadcast %56 : vector<16x1xi1> to vector<16x32xi1>
    %58 = vector.broadcast %cst_47 : f32 to vector<16x32xf32>
    %59 = arith.select %57, %55, %58 : vector<16x32xi1>, vector<16x32xf32>
    %60 = arith.truncf %59 : vector<16x32xf32> to vector<16x32xbf16>
    %c0_48 = arith.constant 0 : index
    %c0_49 = arith.constant 0 : index
    %61 = vector.load %arg17[%c0_48, %c0_49] : memref<18x32xbf16, #tpu.memory_space<vmem>>, vector<16x32xbf16>
    tpu.vector_store %arg17[%c0_48, %c0_49], %60 {strides = array<i32>} : memref<18x32xbf16, #tpu.memory_space<vmem>>, vector<16x32xbf16>,
    %c0_50 = arith.constant 0 : index
    %c0_51 = arith.constant 0 : index
    %62 = vector.load %arg17[%c0_50, %c0_51] : memref<18x32xbf16, #tpu.memory_space<vmem>>, vector<16x32xbf16>
    %c2_52 = arith.constant 2 : index
    %c0_53 = arith.constant 0 : index
    %63 = vector.load %arg17[%c2_52, %c0_53] : memref<18x32xbf16, #tpu.memory_space<vmem>>, vector<16x32xbf16>
    %64 = tpu.concatenate %62, %63 in 1 : vector<16x32xbf16>, vector<16x32xbf16> -> vector<16x64xbf16>
    %c0_54 = arith.constant 0 : index
    %c0_55 = arith.constant 0 : index
    %65 = vector.load %arg12[%c0_54, %c0_55] : memref<64x32xbf16, #tpu.memory_space<vmem>>, vector<64x32xbf16>
    %cst_56 = arith.constant dense<0.000000e+00> : vector<16x32xf32>
    %66 = tpu.matmul %64, %65, %cst_56 {dimension_numbers = #tpu.dot_dimension_numbers<[1], [0], [0], [1], [0, 0, 1, 1], [], []>} : vector<16x64xbf16>, vector<64x32xbf16>, vector<16x32xf32> -> vector<16x32xf32>
    %c0_57 = arith.constant 0 : index
    %c0_58 = arith.constant 0 : index
    %67 = vector.load %arg13[%c0_57, %c0_58] : memref<1x32xf32, #tpu.memory_space<vmem>>, vector<1x32xf32>
    %68 = vector.broadcast %67 : vector<1x32xf32> to vector<16x32xf32>
    %69 = arith.addf %66, %68 : vector<16x32xf32>
    %70 = arith.extf %45 : vector<16x32xbf16> to vector<16x32xf32>
    %71 = arith.addf %69, %70 : vector<16x32xf32>
    %cst_59 = arith.constant 0.000000e+00 : f32
    %72 = vector.broadcast %cst_59 : f32 to vector<16x32xf32>
    %73 = arith.maximumf %71, %72 : vector<16x32xf32>
    %cst_60 = arith.constant 0.000000e+00 : f32
    %74 = vector.shape_cast %2 : vector<16x1xi1> to vector<16x1xi1>
    %75 = vector.broadcast %74 : vector<16x1xi1> to vector<16x32xi1>
    %76 = vector.broadcast %cst_60 : f32 to vector<16x32xf32>
    %77 = arith.select %75, %73, %76 : vector<16x32xi1>, vector<16x32xf32>
    %c0_61 = arith.constant 0 : index
    %c0_62 = arith.constant 0 : index
    %78 = vector.load %arg2[%c0_61, %c0_62] : memref<1x16xbf16, #tpu.memory_space<vmem>>, vector<1x16xbf16>
    %79 = arith.truncf %77 : vector<16x32xf32> to vector<16x32xbf16>
    %cst_63 = arith.constant dense<0.000000e+00> : vector<1x32xf32>
    %80 = tpu.matmul %78, %79, %cst_63 {dimension_numbers = #tpu.dot_dimension_numbers<[1], [0], [0], [1], [0, 0, 1, 1], [], []>} : vector<1x16xbf16>, vector<16x32xbf16>, vector<1x32xf32> -> vector<1x32xf32>
    %81 = arith.truncf %80 : vector<1x32xf32> to vector<1x32xbf16>
    %c0_64 = arith.constant 0 : index
    %c0_65 = arith.constant 0 : index
    %82 = vector.load %arg14[%c0_64, %c0_65] : memref<32x1xbf16, #tpu.memory_space<vmem>>, vector<32x1xbf16>
    %cst_66 = arith.constant dense<0.000000e+00> : vector<1x1xf32>
    %83 = tpu.matmul %81, %82, %cst_66 {dimension_numbers = #tpu.dot_dimension_numbers<[1], [0], [0], [1], [0, 0, 1, 1], [], []>} : vector<1x32xbf16>, vector<32x1xbf16>, vector<1x1xf32> -> vector<1x1xf32>
    %c0_67 = arith.constant 0 : index
    %c0_68 = arith.constant 0 : index
    %84 = vector.load %arg15[%c0_67, %c0_68] : memref<1x1xf32, #tpu.memory_space<vmem>>, vector<1x1xf32>
    %85 = arith.addf %83, %84 : vector<1x1xf32>
    %c0_69 = arith.constant 0 : index
    %c0_70 = arith.constant 0 : index
    %c0_71 = arith.constant 0 : index
    %86 = vector.load %arg16[%c0_69, %c0_70, %c0_71] : memref<1x1x1xf32, #tpu.memory_space<vmem>>, vector<1x1x1xf32>
    %87 = vector.shape_cast %86 : vector<1x1x1xf32> to vector<1x1xf32>
    %88 = vector.shape_cast %85 : vector<1x1xf32> to vector<1x1x1xf32>
    tpu.vector_store %arg16[%c0_69, %c0_70, %c0_71], %88 {strides = array<i32>} : memref<1x1x1xf32, #tpu.memory_space<vmem>>, vector<1x1x1xf32>,
    return
  }
  func.func @transform_0(%arg0: i32) -> (i32, i32) {
    %c0_i32 = arith.constant 0 : i32
    %c0_i32_0 = arith.constant 0 : i32
    %c0_i32_1 = arith.constant 0 : i32
    return %c0_i32, %c0_i32_0 : i32, i32
  }
  func.func @transform_1(%arg0: i32) -> (i32, i32) {
    %c0_i32 = arith.constant 0 : i32
    %c0_i32_0 = arith.constant 0 : i32
    %c0_i32_1 = arith.constant 0 : i32
    return %c0_i32, %c0_i32_0 : i32, i32
  }
  func.func @transform_2(%arg0: i32) -> (i32, i32, i32) {
    %c0_i32 = arith.constant 0 : i32
    %c0_i32_0 = arith.constant 0 : i32
    %c0_i32_1 = arith.constant 0 : i32
    return %arg0, %c0_i32, %c0_i32_0 : i32, i32, i32
  }
  func.func @transform_3(%arg0: i32) -> (i32, i32) {
    %c0_i32 = arith.constant 0 : i32
    %c0_i32_0 = arith.constant 0 : i32
    %c0_i32_1 = arith.constant 0 : i32
    return %c0_i32, %c0_i32_0 : i32, i32
  }
  func.func @transform_4(%arg0: i32) -> (i32, i32) {
    %c0_i32 = arith.constant 0 : i32
    %c0_i32_0 = arith.constant 0 : i32
    %c0_i32_1 = arith.constant 0 : i32
    return %c0_i32, %c0_i32_0 : i32, i32
  }
  func.func @transform_5(%arg0: i32) -> (i32, i32) {
    %c0_i32 = arith.constant 0 : i32
    %c0_i32_0 = arith.constant 0 : i32
    %c0_i32_1 = arith.constant 0 : i32
    return %c0_i32, %c0_i32_0 : i32, i32
  }
  func.func @transform_6(%arg0: i32) -> (i32, i32) {
    %c0_i32 = arith.constant 0 : i32
    %c0_i32_0 = arith.constant 0 : i32
    %c0_i32_1 = arith.constant 0 : i32
    return %c0_i32, %c0_i32_0 : i32, i32
  }
  func.func @transform_7(%arg0: i32) -> (i32, i32) {
    %c0_i32 = arith.constant 0 : i32
    %c0_i32_0 = arith.constant 0 : i32
    %c0_i32_1 = arith.constant 0 : i32
    return %c0_i32, %c0_i32_0 : i32, i32
  }
  func.func @transform_8(%arg0: i32) -> (i32, i32) {
    %c0_i32 = arith.constant 0 : i32
    %c0_i32_0 = arith.constant 0 : i32
    %c0_i32_1 = arith.constant 0 : i32
    return %c0_i32, %c0_i32_0 : i32, i32
  }
  func.func @transform_9(%arg0: i32) -> (i32, i32) {
    %c0_i32 = arith.constant 0 : i32
    %c0_i32_0 = arith.constant 0 : i32
    %c0_i32_1 = arith.constant 0 : i32
    return %c0_i32, %c0_i32_0 : i32, i32
  }
  func.func @transform_10(%arg0: i32) -> (i32, i32) {
    %c0_i32 = arith.constant 0 : i32
    %c0_i32_0 = arith.constant 0 : i32
    %c0_i32_1 = arith.constant 0 : i32
    return %c0_i32, %c0_i32_0 : i32, i32
  }
  func.func @transform_11(%arg0: i32) -> (i32, i32) {
    %c0_i32 = arith.constant 0 : i32
    %c0_i32_0 = arith.constant 0 : i32
    %c0_i32_1 = arith.constant 0 : i32
    return %c0_i32, %c0_i32_0 : i32, i32
  }
  func.func @transform_12(%arg0: i32) -> (i32, i32) {
    %c0_i32 = arith.constant 0 : i32
    %c0_i32_0 = arith.constant 0 : i32
    %c0_i32_1 = arith.constant 0 : i32
    return %c0_i32, %c0_i32_0 : i32, i32
  }
  func.func @transform_13(%arg0: i32) -> (i32, i32) {
    %c0_i32 = arith.constant 0 : i32
    %c0_i32_0 = arith.constant 0 : i32
    %c0_i32_1 = arith.constant 0 : i32
    return %c0_i32, %c0_i32_0 : i32, i32
  }
  func.func @transform_14(%arg0: i32) -> (i32, i32) {
    %c0_i32 = arith.constant 0 : i32
    %c0_i32_0 = arith.constant 0 : i32
    %c0_i32_1 = arith.constant 0 : i32
    return %c0_i32, %c0_i32_0 : i32, i32
  }
  func.func @transform_15(%arg0: i32) -> (i32, i32, i32) {
    %c0_i32 = arith.constant 0 : i32
    %c0_i32_0 = arith.constant 0 : i32
    %c0_i32_1 = arith.constant 0 : i32
    return %arg0, %c0_i32, %c0_i32_0 : i32, i32, i32
  }
}

</mosaic_0001>

<bundles_post_ra>
// kernel: tcn_forecast.1
= control target key start
LH: loop header
LB: loop body
LE: loop exit
PB: predicated region body
PF: predicated region fallthrough
CT: control target
= control target key end

     0   :  { %s1468_s20 = smov 0   ;;  %s1647_s0 = inlined_call_operand.vmem [shape: f32[16,1], index: 0, kind: input, shape index: {}]   ;;  %s1648_s1 = inlined_call_operand.vmem [shape: bf16[1,16], index: 1, kind: input, shape index: {}]   ;;  %s1649_s2 = inlined_call_operand.vmem [shape: bf16[2,18,4], index: 2, kind: input, shape index: {}]   ;;  %s1650_s3 = inlined_call_operand.vmem [shape: bf16[8,32], index: 3, kind: input, shape index: {}]   ;;  %s1651_s4 = inlined_call_operand.vmem [shape: f32[1,32], index: 4, kind: input, shape index: {}]   ;;  %s1652_s5 = inlined_call_operand.vmem [shape: bf16[64,32], index: 5, kind: input, shape index: {}]   ;;  %s1653_s6 = inlined_call_operand.vmem [shape: f32[1,32], index: 6, kind: input, shape index: {}]   ;;  %s1654_s7 = inlined_call_operand.vmem [shape: bf16[4,32], index: 7, kind: input, shape index: {}]   ;;  %s1655_s8 = inlined_call_operand.vmem [shape: f32[1,32], index: 8, kind: input, shape index: {}]   ;;  %s1656_s9 = inlined_call_operand.vmem [shape: bf16[64,32], index: 9, kind: input, shape index: {}]   ;;  %s1657_s10 = inlined_call_operand.vmem [shape: f32[1,32], index: 10, kind: input, shape index: {}]   ;;  %s1658_s11 = inlined_call_operand.vmem [shape: bf16[64,32], index: 11, kind: input, shape index: {}]   ;;  %s1659_s12 = inlined_call_operand.vmem [shape: f32[1,32], index: 12, kind: input, shape index: {}]   ;;  %s1660_s13 = inlined_call_operand.vmem [shape: bf16[32,1], index: 13, kind: input, shape index: {}]   ;;  %s1661_s14 = inlined_call_operand.<no memory space> [shape: f32[1,1], index: 14, kind: input, shape index: {}]   ;;  %s1662_s15 = inlined_call_operand.vmem [shape: f32[2,1,1], index: 15, kind: output, shape index: {}]  }
   0x1   :  { %v20_v0 = vstv %s1661_s14 }
   0x2   :  { %21 = vst [vmem:[#allocation3] sm:$0x1] %v20_v0 }
   0x3 LB: > { %s1179_s21 = sadd.s32 4294967295, %s1378_s20   ;;  %p1183_p0 = scmp.ge.s32.totalorder %s1378_s20, 1  ;;  %s1378_s20 = sphi %s1468_s20, %s27_s20  }
   0x4   : > { %p439_p1 = scmp.lt.s32.totalorder %s1378_s20, 3 }
   0x6   : > { %p440_p2 = pnand %p1183_p0, %p439_p1 }
   0x7   : > { %p485_p3 = scmp.lt.s32.totalorder (!%p440_p2), %s1179_s21, 1  ;;  %vm538_vm0 = vcmask (!%p440_p2), 1043456   ;;  %v1380_v1 = vmov (!%p440_p2), 0.0   ;;  %v527_v2 = vld [vmem:[%s1650_s3] sm:$0xf] (!%p440_p2)  ;;  %vm1381_vm1 = vmmov (!%p440_p2), 0  }
   0x8   : > { %443 = sbr.rel (%p440_p2) target bundleno = 1861 (0x745), region = 80  ;;  %1262 = vmatprep.subr.bf16.mxu0 (!%p440_p2), %v1380_v1  ;;  %1268 = vmatprep.subr.bf16.mxu1 (!%p440_p2), %v1380_v1  ;;  %v540_v3 = vsel (!%p440_p2), %vm538_vm0, %v527_v2, 0  ;;  %vm509_vm2 = vsmask.f32 (!%p440_p2), 7424  ;;  %v495_v4 = vld [vmem:[%s1647_s0 + $0x8] sm:$0xff] (!%p440_p2)  ;;  %v1382_v5 = vmov (!%p440_p2), 0  }
   0x9   : > { %1263 = vmatpush3.bf16.msra.mxu0 (!%p440_p2), %v540_v3  ;;  %1264 = vmatprep.mubr.msk.bf16.mxu0 (!%p440_p2), %vm1381_vm1, %v1380_v1  ;;  %v494_v6 = vld [vmem:[%s1647_s0] sm:$0xff] (!%p440_p2)  ;;  %vm497_vm3 = vcmp.gt.f32.partialorder (!%p440_p2), %v495_v4, 0.0  ;;  %s1383_s16 = smov (!%p440_p2), 4   ;;  %vm524_vm5 = vcmask (!%p440_p2), 31744   ;;  %vm535_vm6 = vcmask (!%p440_p2), 64512   ;;  %v1353_v21 = vld [vmem:[%s1652_s5 + $0x8] sm:$0xff] (!%p440_p2)  }
   0xa   : > { %1276 = vmatprep.mubr.msk.bf16.mxu1 (!%p440_p2), %vm1381_vm1, %v1380_v1  ;;  %1286 = vmatprep.subr.bf16.mxu0 (!%p440_p2), %v1380_v1  ;;  %v586_v9 = vsel (!%p440_p2), %vm497_vm3, 1, %v1382_v5  ;;  %vm496_vm4 = vcmp.gt.f32.partialorder (!%p440_p2), %v494_v6, 0.0  ;;  %v1352_v20 = vld [vmem:[%s1652_s5] sm:$0xff] (!%p440_p2)   ;;  %v1354_v22 = vld [vmem:[%s1652_s5 + $0x10] sm:$0xff] (!%p440_p2)   ;;  %v1355_v23 = vld [vmem:[%s1652_s5 + $0x18] sm:$0xff] (!%p440_p2)   ;;  %vm605_vm9 = vcmask (!%p440_p2), 257024  }
   0xb   : > { %1346 = vset.pattern.permute.xlu0 (!%p440_p2), %v1382_v5  ;;  %1347 = vset.pattern.permute.xlu1 (!%p440_p2), %v1382_v5  ;;  %v585_v17 = vsel (!%p440_p2), %vm496_vm4, 1, %v1382_v5  ;;  %v1187_v24 = vld [vmem:[%s1651_s4] ss:$0 sm:$0xff] (!%p440_p2)  ;;  %v1351_v39 = vld [vmem:[#allocation2 + $0x8] ss:$0 sps:$4 sm:$0x11] (!%p440_p2)  }
   0xc   : > { %591 = vperm.xlu1 (!%p440_p2), %1347, %v586_v9   ;;  %1269 = vmatpush3.bf16.msra.mxu1 (!%p440_p2), %v1352_v20  ;;  %v627_v41 = vshll.u32 (!%p440_p2), %v1351_v39, 16  ;;  %v719_v48 = vld [vmem:[%s1654_s7] sm:$0x3] (!%p440_p2)  ;;  %vm729_vm10 = vcmask (!%p440_p2), 1041408   ;;  %vm633_vm11 = vcmask (!%p440_p2), 261120   ;;  %vm675_vm12 = vcmask (!%p440_p2), 523264  }
   0xd   : > { %1270 = vmatprep.subr.bf16.mxu1 (!%p440_p2), %v1380_v1  ;;  %v731_v50 = vsel (!%p440_p2), %vm729_vm10, %v719_v48, 0  ;;  %v1358_v52 = vld [vmem:[%s1656_s9] sm:$0xff] (!%p440_p2)   ;;  %v1359_v53 = vld [vmem:[%s1656_s9 + $0x8] sm:$0xff] (!%p440_p2)   ;;  %v1360_v54 = vld [vmem:[%s1656_s9 + $0x10] sm:$0xff] (!%p440_p2)   ;;  %vm805_vm13 = vcmask (!%p440_p2), 1046528   ;;  %vm1025_vm15 = vcmask (!%p440_p2), 130048  }
   0xe   : > { %v629_v45 = vrot.slane (!%p440_p2), %v627_v41, 1  ;;  %v1361_v55 = vld [vmem:[%s1656_s9 + $0x18] sm:$0xff] (!%p440_p2)   ;;  %v1193_v56 = vld [vmem:[%s1653_s6] ss:$0 sm:$0xff] (!%p440_p2)  ;;  %v1366_v20 = vld [vmem:[%s1658_s11 + $0x8] sm:$0xff] (!%p440_p2)   ;;  %vm1130_vm0 = vcmask (!%p440_p2), 0  }
   0xf   : > { %s1664_s21 = smov (!%p485_p3, %s1179_s21), 1  ;;  %v1199_v57 = vld [vmem:[%s1655_s8] ss:$0 sm:$0xff] }
  0x10   : > { %s1332_s23 = smul.u32 12, %s1664_s21  ;;  %1271 = vmatpush3.bf16.msra.mxu1 %v1353_v21  ;;  %v1324_v58 = vadd.f32 %v1199_v57, %v1193_v56  ;;  %v1367_v21 = vld [vmem:[%s1658_s11 + $0x10] sm:$0xff]   ;;  %s492_s22 = scalar_lea.vmem %s1662_s15, %s1664_s21 }
  0x11   : > { %1272 = vmatprep.subr.bf16.mxu1 %v1380_v1 }
  0x12   : > { %s489_s28 = scalar_lea.vmem %s1649_s2, %s1332_s23 }
  0x13   : > { %v1498_v7 = vld [vmem:[%s489_s28] sm:$0xff]   ;;  %v1349_v8 = vld [vmem:[%s489_s28 + $0x8] ss:$0 sps:$4 sm:$0x11]   ;;  %s1384_s28 = smov 32  }
  0x14   : > { %v511_v10 = vshrl.u32 %v1498_v7, 16  ;;  %v513_v11 = vshll.u32 %v1498_v7, 16  ;;  %v518_v12 = vshll.u32 %v1349_v8, 16  ;;  %1273 = vmatpush3.bf16.msra.mxu1 %v1354_v22  ;;  %v1357_v8 = vld [vmem:[#allocation2 + $0x8] ss:$0 sps:$4 sm:$0x11]  }
  0x15   : > { %1274 = vmatprep.subr.bf16.mxu1 %v1380_v1  ;;  %v1368_v22 = vld [vmem:[%s1658_s11 + $0x18] sm:$0xff]  }
  0x16   : > { %v515_v13 = vrot.slane %v513_v11, 1  ;;  %v520_v14 = vrot.slane %v518_v12, 1  ;;  %v807_v12 = vrot.slane %v1357_v8, 1 }
  0x18   : > { %v516_v15 = vor.u32 %v515_v13, %v511_v10  ;;  %1275 = vmatpush3.bf16.msra.mxu1 %v1355_v23  ;;  %v1206_v23 = vld [vmem:[%s1657_s10] ss:$0 sm:$0xff] }
  0x19   : > { %1280 = vmatprep.subr.bf16.mxu1 %v1380_v1 }
  0x1a   : > { %v521_v16 = vsel %vm509_vm2, %v516_v15, %v520_v14 }
  0x1b   : > { %522 = vrot.lane.b32.xlu0 %v521_v16, %s1383_s16 }
  0x1f   : > { %588 = vperm.xlu0 %1346, %v585_v17  }
  0x8b   : > { %v1528_v29 = vpop.permute.xlu1 %591 }
  0x8c   : > { %vm594_vm8 = vcmp.eq.s32.totalorder %v1528_v29, 1 }
  0x8d   : > { %v523_v18 = vpop.permute.xlu0 %522 }
  0x8e   : > { %v526_v19 = vsel %vm524_vm5, %v1498_v7, %v523_v18 }
  0x8f   : > { %1265 = vmatmul.mubr.msk.bf16.vlgmr.msra.gmra.mrb[0].mxu0 %vm535_vm6, %v526_v19  ;;  %v1365_v19 = vld [vmem:[%s1658_s11] sm:$0xff]  }
  0x90   : > { %1294 = vmatprep.mubr.msk.bf16.mxu0 %vm1381_vm1, %v1380_v1  ;;  %1287 = vmatpush3.bf16.msra.mxu0 %v1358_v52 }
  0x91   : > { %1288 = vmatprep.subr.bf16.mxu0 %v1380_v1 }
  0x94   : > { %1289 = vmatpush3.bf16.msra.mxu0 %v1359_v53 }
  0x95   : > { %1290 = vmatprep.subr.bf16.mxu0 %v1380_v1 }
  0x98   : > { %1291 = vmatpush3.bf16.msra.mxu0 %v1360_v54 }
  0x99   : > { %1292 = vmatprep.subr.bf16.mxu0 %v1380_v1 }
  0x9c   : > { %1293 = vmatpush3.bf16.msra.mxu0 %v1361_v55 }
  0x9d   : > { %1298 = vmatprep.subr.bf16.mxu0 %v1380_v1 }
  0x9e   : > { %v1526_v25 = vpop.permute.xlu0 %588 }
  0x9f   : > { %vm593_vm7 = vcmp.eq.s32.totalorder %v1526_v25, 1  ;;  %v1371_v25 = vld [vmem:[%s1660_s13 + $0x8] sm:$0xff]  }
  0xa0   : > { %vm1223_vm14 = vmpackc.low %vm594_vm8, %vm593_vm7 }
 0x162   : > { %v576_v26 = vpop.f32.mrb[0].mxu0 }
 0x163   : > { %v577_v27 = vadd.f32 %v1187_v24, %v576_v26  ;;  %v1266_v28 = vpop.f32.mrb[1].mxu0 }
 0x164   : > { %v579_v30 = vpop.f32.mrb[2].mxu0 }
 0x165   : > { %v583_v31 = vmax.f32 %v577_v27, 0.0  ;;  %v580_v32 = vadd.f32 %v1187_v24, %v579_v30  ;;  %v1267_v33 = vpop.f32.mrb[3].mxu0 }
 0x167   : > { %v584_v34 = vmax.f32 %v580_v32, 0.0  ;;  %v595_v35 = vsel %vm593_vm7, %v583_v31, 0.0 }
 0x168   : > { %v1232_v36 = vpack.c.bf16 %v595_v35, %v595_v35 }
 0x169   : > { %v596_v37 = vsel %vm594_vm8, %v584_v34, 0.0 }
 0x16a   : > { %606 = vst.msk [vmem:[#allocation2] sm:$0xf] %vm605_vm9, %v1232_v36  ;;  %v1233_v38 = vpack.c.bf16 %v596_v37, %v596_v37 }
 0x16c   : > { %607 = vst.msk [vmem:[#allocation2 + $0x4] sm:$0xf] %vm605_vm9, %v1233_v38  ;;  %v1364_v38 = vld [vmem:[#allocation2 + $0x8] ss:$0 sps:$4 sm:$0x11]  }
 0x173   : > { %v1350_v40 = vld [vmem:[#allocation2] sm:$0xff]  }
 0x174   : > { %v622_v42 = vshll.u32 %v1350_v40, 16  ;;  %v620_v43 = vshrl.u32 %v1350_v40, 16 }
 0x176   : > { %v624_v44 = vrot.slane %v622_v42, 1  ;;  %v926_v42 = vrot.slane %v1364_v38, 1 }
 0x178   : > { %v625_v46 = vor.u32 %v624_v44, %v620_v43 }
 0x17a   : > { %v630_v47 = vsel %vm509_vm2, %v625_v46, %v629_v45 }
 0x17b   : > { %631 = vrot.lane.b32.xlu1 %v630_v47, %s1384_s28 }
 0x1ed   : > { %v632_v49 = vpop.permute.xlu1 %631 }
 0x1ee   : > { %v635_v51 = vsel %vm633_vm11, %v1350_v40, %v632_v49  ;;  %v1217_v49 = vld [vmem:[%s1659_s12] ss:$0 sm:$0xff] }
 0x1ef   : > { %1277 = vmatmul.mubr.msk.bf16.vlgmr.msra.gmra.mrb[0].mxu1 %vm675_vm12, %v635_v51 }
 0x1f0   : > { %1281 = vmatpush3.bf16.msra.mxu1 %v731_v50  ;;  %1282 = vmatprep.mubr.msk.bf16.mxu1 %vm1381_vm1, %v1380_v1 }
 0x1f1   : > { %1310 = vmatprep.subr.bf16.mxu1 %v1380_v1 }
 0x1fb   : > { %1283 = vmatmul.mubr.msk.bf16.vlgmr.msra.gmra.mrb[0].mxu1 %vm524_vm5, %v1498_v7 }
 0x1fc   : > { %1312 = vmatprep.mubr.msk.bf16.mxu1 %vm1381_vm1, %v1380_v1 }
 0x2ce   : > { %v767_v59 = vpop.f32.mrb[0].mxu1 }
 0x2cf   : > { %v1325_v60 = vadd.f32 %v1324_v58, %v767_v59  ;;  %v1284_v61 = vpop.f32.mrb[1].mxu1 }
 0x2d0   : > { %v770_v62 = vpop.f32.mrb[2].mxu1 }
 0x2d1   : > { %v776_v63 = vmax.f32 %v1325_v60, 0.0  ;;  %v1327_v0 = vadd.f32 %v1324_v58, %v770_v62  ;;  %v1285_v2 = vpop.f32.mrb[3].mxu1 }
 0x2d3   : > { %v778_v3 = vsel %vm593_vm7, %v776_v63, 0.0  ;;  %v777_v4 = vmax.f32 %v1327_v0, 0.0  ;;  %v1023_v63 = vld [vmem:[%s1648_s1] sm:$0x1] }
 0x2d4   : > { %v1234_v5 = vpack.c.bf16 %v778_v3, %v778_v3  ;;  %v1370_v0 = vld [vmem:[%s1660_s13] sm:$0xff]  }
 0x2d5   : > { %v779_v6 = vsel %vm594_vm8, %v777_v4, 0.0 }
 0x2d6   : > { %788 = vst.msk [vmem:[#allocation2] sm:$0xf] %vm605_vm9, %v1234_v5  ;;  %v1235_v7 = vpack.c.bf16 %v779_v6, %v779_v6  ;;  %v1074_v6 = vld [vmem:[#allocation3] sm:$0x1] }
 0x2d8   : > { %789 = vst.msk [vmem:[#allocation2 + $0x4] sm:$0xf] %vm605_vm9, %v1235_v7 }
 0x2dd   : > { %v792_v10 = vld [vmem:[#allocation2] sm:$0xe] }
 0x2de   : > { %v790_v15 = vld [vmem:[#allocation2] sm:$0xf] }
 0x2df   : > { %v1580_v9 = vld [vmem:[#allocation2 + $0x4] sm:$0xf]  ;;  %v1015_v52 = vunpack.c.l.bf16 %v790_v15 }
 0x2e0   : > { %v1204_v11 = vcombine.low %v792_v10, %v1580_v9  ;;  %v1203_v16 = vcombine.low %v790_v15, %v1580_v9  ;;  %v1016_v57 = vunpack.c.l.bf16 %v1580_v9 }
 0x2e2   : > { %v806_v13 = vrot.slane %v1204_v11, 1 }
 0x2e4   : > { %v808_v14 = vsel %vm805_vm13, %v806_v13, %v807_v12 }
 0x2e5   : > { %809 = vrot.lane.b32.xlu1 %v808_v14, %s1384_s28 }
 0x357   : > { %v810_v17 = vpop.permute.xlu1 %809 }
 0x358   : > { %v813_v18 = vsel %vm633_vm11, %v1203_v16, %v810_v17 }
 0x359   : > { %1295 = vmatmul.mubr.msk.bf16.vlgmr.msra.gmra.mrb[4].mxu0 %vm675_vm12, %v813_v18 }
 0x35a   : > { %1306 = vmatprep.mubr.msk.bf16.mxu0 %vm1381_vm1, %v1380_v1  ;;  %1299 = vmatpush3.bf16.msra.mxu0 %v1365_v19 }
 0x35b   : > { %1300 = vmatprep.subr.bf16.mxu0 %v1380_v1 }
 0x35e   : > { %1301 = vmatpush3.bf16.msra.mxu0 %v1366_v20 }
 0x35f   : > { %1302 = vmatprep.subr.bf16.mxu0 %v1380_v1 }
 0x362   : > { %1303 = vmatpush3.bf16.msra.mxu0 %v1367_v21 }
 0x363   : > { %1304 = vmatprep.subr.bf16.mxu0 %v1380_v1 }
 0x366   : > { %1305 = vmatpush3.bf16.msra.mxu0 %v1368_v22 }
 0x42c   : > { %v889_v24 = vpop.f32.mrb[4].mxu0 }
 0x42d   : > { %v890_v26 = vadd.f32 %v1206_v23, %v889_v24  ;;  %v1296_v27 = vpop.f32.mrb[5].mxu0 }
 0x42e   : > { %v892_v28 = vpop.f32.mrb[6].mxu0 }
 0x42f   : > { %v896_v30 = vmax.f32 %v890_v26, 0.0  ;;  %v893_v31 = vadd.f32 %v1206_v23, %v892_v28  ;;  %v1297_v32 = vpop.f32.mrb[7].mxu0 }
 0x431   : > { %v898_v33 = vsel %vm593_vm7, %v896_v30, 0.0  ;;  %v897_v34 = vmax.f32 %v893_v31, 0.0 }
 0x432   : > { %v1236_v35 = vpack.c.bf16 %v898_v33, %v898_v33 }
 0x433   : > { %v899_v36 = vsel %vm594_vm8, %v897_v34, 0.0 }
 0x434   : > { %908 = vst.msk [vmem:[#allocation2] sm:$0xf] %vm605_vm9, %v1236_v35  ;;  %v1237_v37 = vpack.c.bf16 %v899_v36, %v899_v36 }
 0x436   : > { %909 = vst.msk [vmem:[#allocation2 + $0x4] sm:$0xf] %vm605_vm9, %v1237_v37 }
 0x43b   : > { %v912_v40 = vld [vmem:[#allocation2] sm:$0xe] }
 0x43c   : > { %v910_v45 = vld [vmem:[#allocation2] sm:$0xf] }
 0x43d   : > { %v911_v39 = vld [vmem:[#allocation2 + $0x4] sm:$0xf] }
 0x43e   : > { %v1215_v41 = vcombine.low %v912_v40, %v911_v39  ;;  %v1214_v46 = vcombine.low %v910_v45, %v911_v39 }
 0x440   : > { %v925_v43 = vrot.slane %v1215_v41, 1 }
 0x442   : > { %v927_v44 = vsel %vm805_vm13, %v925_v43, %v926_v42 }
 0x443   : > { %928 = vrot.lane.b32.xlu0 %v927_v44, %s1384_s28 }
 0x4b5   : > { %v929_v47 = vpop.permute.xlu0 %928 }
 0x4b6   : > { %v932_v48 = vsel %vm633_vm11, %v1214_v46, %v929_v47 }
 0x4b7   : > { %1307 = vmatmul.mubr.msk.bf16.vlgmr.msra.gmra.mrb[8].mxu0 %vm675_vm12, %v932_v48 }
 0x58a   : > { %v1008_v50 = vpop.f32.mrb[8].mxu0 }
 0x58b   : > { %v1009_v51 = vadd.f32 %v1217_v49, %v1008_v50  ;;  %v1308_v53 = vpop.f32.mrb[9].mxu0 }
 0x58c   : > { %v1011_v54 = vpop.f32.mrb[10].mxu0 }
 0x58d   : > { %v1017_v55 = vadd.f32 %v1015_v52, %v1009_v51  ;;  %v1012_v56 = vadd.f32 %v1217_v49, %v1011_v54  ;;  %v1309_v58 = vpop.f32.mrb[11].mxu0 }
 0x58f   : > { %v1018_v59 = vadd.f32 %v1016_v57, %v1012_v56  ;;  %v1019_v60 = vmax.f32 %v1017_v55, 0.0 }
 0x591   : > { %v1020_v61 = vmax.f32 %v1018_v59, 0.0 }
 0x593   : > { %v1224_v62 = vpack.c.bf16 %v1020_v61, %v1019_v60 }
 0x595   : > { %1311 = vmatpush3.bf16.msk.msra.mxu1 %vm1223_vm14, %v1224_v62 }
 0x596   : > { %1316 = vmatprep.subr.bf16.mxu1 %v1380_v1 }
 0x598   : > { %1313 = vmatmul.mubr.msk.bf16.vlgmr.msra.gmra.mrb[4].mxu1 %vm1025_vm15, %v1023_v63 }
 0x599   : > { %1317 = vmatpush3.bf16.msra.mxu1 %v1370_v0  ;;  %1320 = vmatprep.mubr.msk.bf16.mxu1 %vm1381_vm1, %v1380_v1 }
 0x59a   : > { %1318 = vmatprep.subr.bf16.mxu1 %v1380_v1 }
 0x59d   : > { %1319 = vmatpush3.bf16.msra.mxu1 %v1371_v25 }
 0x66b   : > { %v1063_v29 = vpop.f32.mrb[4].mxu1 }
 0x66c   : > { %v1069_v2 = vpack.c.bf16 %v1063_v29, %v1063_v29  ;;  %v1314_v3 = vpop.f32.mrb[5].mxu1 }
 0x66d   : > { %v1066_v4 = vpop.f32.mrb[6].mxu1 }
 0x66e   : > { %v1315_v5 = vpop.f32.mrb[7].mxu1  ;;  %1321 = vmatmul.mubr.msk.bf16.vlgmr.msra.gmra.mrb[8].mxu1 %vm633_vm11, %v1069_v2 }
 0x741   : > { %v1124_v7 = vpop.f32.mrb[8].mxu1 }
 0x742   : > { %v1125_v1 = vadd.f32 %v1124_v7, %v1074_v6  ;;  %v1322_v8 = vpop.f32.mrb[9].mxu1 }
 0x743   : > { %v1127_v9 = vpop.f32.mrb[10].mxu1 }
 0x744   : > { %1131 = vst.msk [vmem:[%s492_s22] sm:$0x1] %vm1130_vm0, %v1125_v1  ;;  %v1323_v10 = vpop.f32.mrb[11].mxu1 }
 0x745 PF: > { %s27_s20 = sadd.s32 1, %s1378_s20  }
 0x746   : > { %p24_p4 = scmp.ge.s32.totalorder %s27_s20, 4  }
 0x748   :  { %26 = sbr.rel (!%p24_p4) target bundleno = 3 (0x3), region = 110 }

</bundles_post_ra>
